<compile_context>
chip_gen: v7x
topology: tpu7x:2x2x1
jax: 0.10.0
libtpu: 0.0.40
codegen_flags: <defaults>
</compile_context>

<pallas_src>
import jax
import jax.numpy as jnp
from jax.experimental import pallas as pl
from jax.experimental.pallas import tpu as pltpu


def value_head_kernel(x_ref, wc_ref, bc_ref, w1_ref, b1_ref, w2_ref, b2_ref, o_ref):
    """Fused value head for one batch tile.

    x_ref:  (Cin, TB, HW)  VMEM   channel-major input tile (lane axis = H*W)
    wc_ref: (Cmid, Cin)    SMEM   BN-folded 1x1-conv weight (read as scalars)
    bc_ref: (Cmid,)        SMEM   BN-folded conv bias
    w1_ref: (Cmid, HW, I)  VMEM   fc1 weight, pre-reshaped to NCHW-flatten order
    b1_ref: (1, I)         VMEM
    w2_ref: (I, 1)         VMEM
    b2_ref: (1, 1)         VMEM
    o_ref:  (TB, 1)        VMEM
    """
    cin = x_ref.shape[0]
    tb = x_ref.shape[1]
    cmid, _, inter = w1_ref.shape

    # Per-channel input slabs; leading-dim ref loads are layout-preserving.
    xc = [x_ref[c] for c in range(cin)]                       # each (TB, HW)

    # Fused conv(1x1)+BN+ReLU (VPU broadcast-MACs) and fc1 (MXU), one middle
    # channel at a time; the activation stays in vregs/VMEM, never in HBM.
    h = jnp.zeros((tb, inter), dtype=jnp.float32)
    for m in range(cmid):              # middle_channels is small for a value head
        acc = xc[0] * wc_ref[m, 0]
        for c in range(1, cin):
            acc = acc + xc[c] * wc_ref[m, c]
        y_m = jnp.maximum(acc + bc_ref[m], 0.0)               # (TB, HW)
        h = h + jnp.dot(y_m, w1_ref[m], preferred_element_type=jnp.float32)

    h = jnp.maximum(h + b1_ref[...], 0.0)                     # (TB, I)
    out = jnp.dot(h, w2_ref[...], preferred_element_type=jnp.float32) + b2_ref[...]
    o_ref[...] = jnp.tanh(out)                                # (TB, 1)


def prepare_params(params, eps=1e-5):
    """Fold eval-mode BN into the conv and pre-reshape FC weights (one-time)."""
    w_conv = params["w_conv"]                    # (Cmid, Cin)
    b_conv = params["b_conv"]                    # (Cmid,)
    scale = params["gamma"] / jnp.sqrt(params["rvar"] + eps)
    shift = params["beta"] - params["rmean"] * scale
    wc = w_conv * scale[:, None]                 # folded conv weight (Cmid, Cin)
    bc = b_conv * scale + shift                  # folded conv bias   (Cmid,)

    w1 = params["w1"]                            # (I, F), F = Cmid*H*W in NCHW order
    i_dim, f_dim = w1.shape
    cmid = w_conv.shape[0]
    hw = f_dim // cmid
    # One-time weight reshape; removes any per-forward activation transpose.
    w1_r = jnp.transpose(w1, (1, 0)).reshape(cmid, hw, i_dim)   # (Cmid, HW, I)
    b1 = params["b1"].reshape(1, i_dim)
    w2 = jnp.transpose(params["w2"], (1, 0))     # (I, 1)
    b2 = params["b2"].reshape(1, 1)
    return wc, bc, w1_r, b1, w2, b2


def value_head_forward(x, params, *, batch_tile=8):
    """x: (N, Cin, H, W) float32 (NCHW, like PyTorch). Returns (N, 1)."""
    n, cin, hh, ww = x.shape
    hw = hh * ww
    wc, bc, w1_r, b1, w2, b2 = prepare_params(params)
    cmid = wc.shape[0]
    i_dim = b1.shape[1]

    # Batch tile: multiple of 8 (sublane tiling of the (TB, 1) output block).
    tb = max(8, (batch_tile // 8) * 8)
    n_pad = pl.cdiv(n, tb) * tb

    # Channel-major (Cin, N, HW): per-channel slabs become leading-dim loads and
    # the lane axis carries H*W (1x1 conv leaves the spatial index untouched).
    x_cm = jnp.transpose(x.reshape(n, cin, hw), (1, 0, 2))
    if n_pad != n:
        x_cm = jnp.pad(x_cm, ((0, 0), (0, n_pad - n), (0, 0)))

    out = pl.pallas_call(
        value_head_kernel,
        out_shape=jax.ShapeDtypeStruct((n_pad, 1), jnp.float32),
        grid_spec=pltpu.PrefetchScalarGridSpec(
            num_scalar_prefetch=0,
            grid=(n_pad // tb,),
            in_specs=[
                pl.BlockSpec((cin, tb, hw), lambda i: (0, i, 0)),      # x tile
                pl.BlockSpec(memory_space=pltpu.MemorySpace.SMEM),     # wc (scalars)
                pl.BlockSpec(memory_space=pltpu.MemorySpace.SMEM),     # bc (scalars)
                pl.BlockSpec((cmid, hw, i_dim), lambda i: (0, 0, 0)),  # w1 (resident)
                pl.BlockSpec((1, i_dim), lambda i: (0, 0)),            # b1
                pl.BlockSpec((i_dim, 1), lambda i: (0, 0)),            # w2
                pl.BlockSpec((1, 1), lambda i: (0, 0)),                # b2
            ],
            out_specs=pl.BlockSpec((tb, 1), lambda i: (i, 0)),
        ),
        compiler_params=pltpu.CompilerParams(
            dimension_semantics=("parallel",),
        ),
    )(x_cm, wc, bc, w1_r, b1, w2, b2)
    return out[:n]


def value_head_reference(x, params):
    """Pure-JAX reference mirroring the PyTorch module (eval-mode BN)."""
    eps = 1e-5
    n, cin, hh, ww = x.shape
    w_conv, b_conv = params["w_conv"], params["b_conv"]
    y = jnp.einsum("nchw,mc->nmhw", x, w_conv) + b_conv[None, :, None, None]
    scale = params["gamma"] / jnp.sqrt(params["rvar"] + eps)
    shift = params["beta"] - params["rmean"] * scale
    y = y * scale[None, :, None, None] + shift[None, :, None, None]
    y = jnp.maximum(y, 0.0)
    y = y.reshape(n, -1)
    y = jnp.maximum(y @ params["w1"].T + params["b1"], 0.0)
    return jnp.tanh(y @ params["w2"].T + params["b2"])


def init_params(key, in_channels, middle_channels, board_area, intermediate_dim):
    ks = jax.random.split(key, 8)
    f_dim = board_area * middle_channels
    return {
        "w_conv": jax.random.normal(ks[0], (middle_channels, in_channels), jnp.float32) * 0.1,
        "b_conv": jax.random.normal(ks[1], (middle_channels,), jnp.float32) * 0.1,
        "gamma": 1.0 + 0.1 * jax.random.normal(ks[2], (middle_channels,), jnp.float32),
        "beta": 0.1 * jax.random.normal(ks[3], (middle_channels,), jnp.float32),
        "rmean": 0.1 * jax.random.normal(ks[4], (middle_channels,), jnp.float32),
        "rvar": 1.0 + 0.1 * jnp.abs(jax.random.normal(ks[5], (middle_channels,), jnp.float32)),
        "w1": jax.random.normal(ks[6], (intermediate_dim, f_dim), jnp.float32) * 0.05,
        "b1": jnp.zeros((intermediate_dim,), jnp.float32),
        "w2": jax.random.normal(ks[7], (1, intermediate_dim), jnp.float32) * 0.05,
        "b2": jnp.zeros((1,), jnp.float32),
    }


if __name__ == "__main__":
    # Small demo: batch=2, in_channels=4, middle_channels=4, 8x8 board,
    # intermediate_dim=64  ->  fc1 input dim = 4*64 = 256.
    n, cin, hh, ww = 2, 4, 8, 8
    cmid, inter = 4, 64
    key = jax.random.PRNGKey(0)
    kx, kp = jax.random.split(key)
    x = jax.random.normal(kx, (n, cin, hh, ww), jnp.float32)
    params = init_params(kp, cin, cmid, hh * ww, inter)

    out = jax.block_until_ready(value_head_forward(x, params))
    ref = value_head_reference(x, params)
    assert out.shape == (n, 1), out.shape
    assert jnp.allclose(out, ref, atol=1e-5, rtol=1e-5), (out, ref)
    print("KERNEL_OK")
</pallas_src>

<mosaic_0001>
module attributes {stable_mosaic.version = 11 : i64} {
  func.func @value_head_kernel(%arg0: i32, %arg1: memref<4x8x64xf32, #tpu.memory_space<vmem>>, %arg2: memref<4x4xf32, #tpu.memory_space<smem>>, %arg3: memref<4xf32, #tpu.memory_space<smem>>, %arg4: memref<4x64x64xf32, #tpu.memory_space<vmem>>, %arg5: memref<1x64xf32, #tpu.memory_space<vmem>>, %arg6: memref<64x1xf32, #tpu.memory_space<vmem>>, %arg7: memref<1x1xf32, #tpu.memory_space<vmem>>, %arg8: memref<8x1xf32, #tpu.memory_space<vmem>>) attributes {dimension_semantics = [#tpu.dimension_semantics<parallel>], iteration_bounds = array<i64: 1>, scalar_prefetch = 0 : i64, scratch_operands = 0 : i64, tpu.core_type = #tpu.core_type<tc>, window_params = [{transform_indices = @transform_0, window_bounds = array<i64: 4, 8, 64>}, {transform_indices = @transform_1, window_bounds = array<i64: 4, 4>}, {transform_indices = @transform_2, window_bounds = array<i64: 4>}, {pipeline_mode = #tpu.pipeline_mode<synchronous>, transform_indices = @transform_3, window_bounds = array<i64: 4, 64, 64>}, {pipeline_mode = #tpu.pipeline_mode<synchronous>, transform_indices = @transform_4, window_bounds = array<i64: 1, 64>}, {pipeline_mode = #tpu.pipeline_mode<synchronous>, transform_indices = @transform_5, window_bounds = array<i64: 64, 1>}, {pipeline_mode = #tpu.pipeline_mode<synchronous>, transform_indices = @transform_6, window_bounds = array<i64: 1, 1>}, {transform_indices = @transform_7, window_bounds = array<i64: 8, 1>}]} {
    %c0 = arith.constant 0 : index
    %c0_0 = arith.constant 0 : index
    %c0_1 = arith.constant 0 : index
    %0 = vector.load %arg1[%c0, %c0_0, %c0_1] : memref<4x8x64xf32, #tpu.memory_space<vmem>>, vector<1x8x64xf32>
    %1 = vector.shape_cast %0 : vector<1x8x64xf32> to vector<8x64xf32>
    %c1 = arith.constant 1 : index
    %c0_2 = arith.constant 0 : index
    %c0_3 = arith.constant 0 : index
    %2 = vector.load %arg1[%c1, %c0_2, %c0_3] : memref<4x8x64xf32, #tpu.memory_space<vmem>>, vector<1x8x64xf32>
    %3 = vector.shape_cast %2 : vector<1x8x64xf32> to vector<8x64xf32>
    %c2 = arith.constant 2 : index
    %c0_4 = arith.constant 0 : index
    %c0_5 = arith.constant 0 : index
    %4 = vector.load %arg1[%c2, %c0_4, %c0_5] : memref<4x8x64xf32, #tpu.memory_space<vmem>>, vector<1x8x64xf32>
    %5 = vector.shape_cast %4 : vector<1x8x64xf32> to vector<8x64xf32>
    %c3 = arith.constant 3 : index
    %c0_6 = arith.constant 0 : index
    %c0_7 = arith.constant 0 : index
    %6 = vector.load %arg1[%c3, %c0_6, %c0_7] : memref<4x8x64xf32, #tpu.memory_space<vmem>>, vector<1x8x64xf32>
    %7 = vector.shape_cast %6 : vector<1x8x64xf32> to vector<8x64xf32>
    %cst = arith.constant 0.000000e+00 : f32
    %8 = vector.broadcast %cst : f32 to vector<8x64xf32>
    %c0_8 = arith.constant 0 : index
    %c0_9 = arith.constant 0 : index
    %9 = memref.load %arg2[%c0_8, %c0_9] : memref<4x4xf32, #tpu.memory_space<smem>>
    %10 = vector.broadcast %9 : f32 to vector<8x64xf32>
    %11 = arith.mulf %1, %10 : vector<8x64xf32>
    %c0_10 = arith.constant 0 : index
    %c1_11 = arith.constant 1 : index
    %12 = memref.load %arg2[%c0_10, %c1_11] : memref<4x4xf32, #tpu.memory_space<smem>>
    %13 = vector.broadcast %12 : f32 to vector<8x64xf32>
    %14 = arith.mulf %3, %13 : vector<8x64xf32>
    %15 = arith.addf %11, %14 : vector<8x64xf32>
    %c0_12 = arith.constant 0 : index
    %c2_13 = arith.constant 2 : index
    %16 = memref.load %arg2[%c0_12, %c2_13] : memref<4x4xf32, #tpu.memory_space<smem>>
    %17 = vector.broadcast %16 : f32 to vector<8x64xf32>
    %18 = arith.mulf %5, %17 : vector<8x64xf32>
    %19 = arith.addf %15, %18 : vector<8x64xf32>
    %c0_14 = arith.constant 0 : index
    %c3_15 = arith.constant 3 : index
    %20 = memref.load %arg2[%c0_14, %c3_15] : memref<4x4xf32, #tpu.memory_space<smem>>
    %21 = vector.broadcast %20 : f32 to vector<8x64xf32>
    %22 = arith.mulf %7, %21 : vector<8x64xf32>
    %23 = arith.addf %19, %22 : vector<8x64xf32>
    %c0_16 = arith.constant 0 : index
    %24 = memref.load %arg3[%c0_16] : memref<4xf32, #tpu.memory_space<smem>>
    %25 = vector.broadcast %24 : f32 to vector<8x64xf32>
    %26 = arith.addf %23, %25 : vector<8x64xf32>
    %cst_17 = arith.constant 0.000000e+00 : f32
    %27 = vector.broadcast %cst_17 : f32 to vector<8x64xf32>
    %28 = arith.maximumf %26, %27 : vector<8x64xf32>
    %c0_18 = arith.constant 0 : index
    %c0_19 = arith.constant 0 : index
    %c0_20 = arith.constant 0 : index
    %29 = vector.load %arg4[%c0_18, %c0_19, %c0_20] : memref<4x64x64xf32, #tpu.memory_space<vmem>>, vector<1x64x64xf32>
    %30 = vector.shape_cast %29 : vector<1x64x64xf32> to vector<64x64xf32>
    %cst_21 = arith.constant dense<0.000000e+00> : vector<8x64xf32>
    %31 = tpu.matmul %28, %30, %cst_21 {dimension_numbers = #tpu.dot_dimension_numbers<[1], [0], [0], [1], [0, 0, 1, 1], [], []>} : vector<8x64xf32>, vector<64x64xf32>, vector<8x64xf32> -> vector<8x64xf32>
    %32 = arith.addf %8, %31 : vector<8x64xf32>
    %c1_22 = arith.constant 1 : index
    %c0_23 = arith.constant 0 : index
    %33 = memref.load %arg2[%c1_22, %c0_23] : memref<4x4xf32, #tpu.memory_space<smem>>
    %34 = vector.broadcast %33 : f32 to vector<8x64xf32>
    %35 = arith.mulf %1, %34 : vector<8x64xf32>
    %c1_24 = arith.constant 1 : index
    %c1_25 = arith.constant 1 : index
    %36 = memref.load %arg2[%c1_24, %c1_25] : memref<4x4xf32, #tpu.memory_space<smem>>
    %37 = vector.broadcast %36 : f32 to vector<8x64xf32>
    %38 = arith.mulf %3, %37 : vector<8x64xf32>
    %39 = arith.addf %35, %38 : vector<8x64xf32>
    %c1_26 = arith.constant 1 : index
    %c2_27 = arith.constant 2 : index
    %40 = memref.load %arg2[%c1_26, %c2_27] : memref<4x4xf32, #tpu.memory_space<smem>>
    %41 = vector.broadcast %40 : f32 to vector<8x64xf32>
    %42 = arith.mulf %5, %41 : vector<8x64xf32>
    %43 = arith.addf %39, %42 : vector<8x64xf32>
    %c1_28 = arith.constant 1 : index
    %c3_29 = arith.constant 3 : index
    %44 = memref.load %arg2[%c1_28, %c3_29] : memref<4x4xf32, #tpu.memory_space<smem>>
    %45 = vector.broadcast %44 : f32 to vector<8x64xf32>
    %46 = arith.mulf %7, %45 : vector<8x64xf32>
    %47 = arith.addf %43, %46 : vector<8x64xf32>
    %c1_30 = arith.constant 1 : index
    %48 = memref.load %arg3[%c1_30] : memref<4xf32, #tpu.memory_space<smem>>
    %49 = vector.broadcast %48 : f32 to vector<8x64xf32>
    %50 = arith.addf %47, %49 : vector<8x64xf32>
    %cst_31 = arith.constant 0.000000e+00 : f32
    %51 = vector.broadcast %cst_31 : f32 to vector<8x64xf32>
    %52 = arith.maximumf %50, %51 : vector<8x64xf32>
    %c1_32 = arith.constant 1 : index
    %c0_33 = arith.constant 0 : index
    %c0_34 = arith.constant 0 : index
    %53 = vector.load %arg4[%c1_32, %c0_33, %c0_34] : memref<4x64x64xf32, #tpu.memory_space<vmem>>, vector<1x64x64xf32>
    %54 = vector.shape_cast %53 : vector<1x64x64xf32> to vector<64x64xf32>
    %cst_35 = arith.constant dense<0.000000e+00> : vector<8x64xf32>
    %55 = tpu.matmul %52, %54, %cst_35 {dimension_numbers = #tpu.dot_dimension_numbers<[1], [0], [0], [1], [0, 0, 1, 1], [], []>} : vector<8x64xf32>, vector<64x64xf32>, vector<8x64xf32> -> vector<8x64xf32>
    %56 = arith.addf %32, %55 : vector<8x64xf32>
    %c2_36 = arith.constant 2 : index
    %c0_37 = arith.constant 0 : index
    %57 = memref.load %arg2[%c2_36, %c0_37] : memref<4x4xf32, #tpu.memory_space<smem>>
    %58 = vector.broadcast %57 : f32 to vector<8x64xf32>
    %59 = arith.mulf %1, %58 : vector<8x64xf32>
    %c2_38 = arith.constant 2 : index
    %c1_39 = arith.constant 1 : index
    %60 = memref.load %arg2[%c2_38, %c1_39] : memref<4x4xf32, #tpu.memory_space<smem>>
    %61 = vector.broadcast %60 : f32 to vector<8x64xf32>
    %62 = arith.mulf %3, %61 : vector<8x64xf32>
    %63 = arith.addf %59, %62 : vector<8x64xf32>
    %c2_40 = arith.constant 2 : index
    %c2_41 = arith.constant 2 : index
    %64 = memref.load %arg2[%c2_40, %c2_41] : memref<4x4xf32, #tpu.memory_space<smem>>
    %65 = vector.broadcast %64 : f32 to vector<8x64xf32>
    %66 = arith.mulf %5, %65 : vector<8x64xf32>
    %67 = arith.addf %63, %66 : vector<8x64xf32>
    %c2_42 = arith.constant 2 : index
    %c3_43 = arith.constant 3 : index
    %68 = memref.load %arg2[%c2_42, %c3_43] : memref<4x4xf32, #tpu.memory_space<smem>>
    %69 = vector.broadcast %68 : f32 to vector<8x64xf32>
    %70 = arith.mulf %7, %69 : vector<8x64xf32>
    %71 = arith.addf %67, %70 : vector<8x64xf32>
    %c2_44 = arith.constant 2 : index
    %72 = memref.load %arg3[%c2_44] : memref<4xf32, #tpu.memory_space<smem>>
    %73 = vector.broadcast %72 : f32 to vector<8x64xf32>
    %74 = arith.addf %71, %73 : vector<8x64xf32>
    %cst_45 = arith.constant 0.000000e+00 : f32
    %75 = vector.broadcast %cst_45 : f32 to vector<8x64xf32>
    %76 = arith.maximumf %74, %75 : vector<8x64xf32>
    %c2_46 = arith.constant 2 : index
    %c0_47 = arith.constant 0 : index
    %c0_48 = arith.constant 0 : index
    %77 = vector.load %arg4[%c2_46, %c0_47, %c0_48] : memref<4x64x64xf32, #tpu.memory_space<vmem>>, vector<1x64x64xf32>
    %78 = vector.shape_cast %77 : vector<1x64x64xf32> to vector<64x64xf32>
    %cst_49 = arith.constant dense<0.000000e+00> : vector<8x64xf32>
    %79 = tpu.matmul %76, %78, %cst_49 {dimension_numbers = #tpu.dot_dimension_numbers<[1], [0], [0], [1], [0, 0, 1, 1], [], []>} : vector<8x64xf32>, vector<64x64xf32>, vector<8x64xf32> -> vector<8x64xf32>
    %80 = arith.addf %56, %79 : vector<8x64xf32>
    %c3_50 = arith.constant 3 : index
    %c0_51 = arith.constant 0 : index
    %81 = memref.load %arg2[%c3_50, %c0_51] : memref<4x4xf32, #tpu.memory_space<smem>>
    %82 = vector.broadcast %81 : f32 to vector<8x64xf32>
    %83 = arith.mulf %1, %82 : vector<8x64xf32>
    %c3_52 = arith.constant 3 : index
    %c1_53 = arith.constant 1 : index
    %84 = memref.load %arg2[%c3_52, %c1_53] : memref<4x4xf32, #tpu.memory_space<smem>>
    %85 = vector.broadcast %84 : f32 to vector<8x64xf32>
    %86 = arith.mulf %3, %85 : vector<8x64xf32>
    %87 = arith.addf %83, %86 : vector<8x64xf32>
    %c3_54 = arith.constant 3 : index
    %c2_55 = arith.constant 2 : index
    %88 = memref.load %arg2[%c3_54, %c2_55] : memref<4x4xf32, #tpu.memory_space<smem>>
    %89 = vector.broadcast %88 : f32 to vector<8x64xf32>
    %90 = arith.mulf %5, %89 : vector<8x64xf32>
    %91 = arith.addf %87, %90 : vector<8x64xf32>
    %c3_56 = arith.constant 3 : index
    %c3_57 = arith.constant 3 : index
    %92 = memref.load %arg2[%c3_56, %c3_57] : memref<4x4xf32, #tpu.memory_space<smem>>
    %93 = vector.broadcast %92 : f32 to vector<8x64xf32>
    %94 = arith.mulf %7, %93 : vector<8x64xf32>
    %95 = arith.addf %91, %94 : vector<8x64xf32>
    %c3_58 = arith.constant 3 : index
    %96 = memref.load %arg3[%c3_58] : memref<4xf32, #tpu.memory_space<smem>>
    %97 = vector.broadcast %96 : f32 to vector<8x64xf32>
    %98 = arith.addf %95, %97 : vector<8x64xf32>
    %cst_59 = arith.constant 0.000000e+00 : f32
    %99 = vector.broadcast %cst_59 : f32 to vector<8x64xf32>
    %100 = arith.maximumf %98, %99 : vector<8x64xf32>
    %c3_60 = arith.constant 3 : index
    %c0_61 = arith.constant 0 : index
    %c0_62 = arith.constant 0 : index
    %101 = vector.load %arg4[%c3_60, %c0_61, %c0_62] : memref<4x64x64xf32, #tpu.memory_space<vmem>>, vector<1x64x64xf32>
    %102 = vector.shape_cast %101 : vector<1x64x64xf32> to vector<64x64xf32>
    %cst_63 = arith.constant dense<0.000000e+00> : vector<8x64xf32>
    %103 = tpu.matmul %100, %102, %cst_63 {dimension_numbers = #tpu.dot_dimension_numbers<[1], [0], [0], [1], [0, 0, 1, 1], [], []>} : vector<8x64xf32>, vector<64x64xf32>, vector<8x64xf32> -> vector<8x64xf32>
    %104 = arith.addf %80, %103 : vector<8x64xf32>
    %c0_64 = arith.constant 0 : index
    %c0_65 = arith.constant 0 : index
    %105 = vector.load %arg5[%c0_64, %c0_65] : memref<1x64xf32, #tpu.memory_space<vmem>>, vector<1x64xf32>
    %106 = vector.broadcast %105 : vector<1x64xf32> to vector<8x64xf32>
    %107 = arith.addf %104, %106 : vector<8x64xf32>
    %cst_66 = arith.constant 0.000000e+00 : f32
    %108 = vector.broadcast %cst_66 : f32 to vector<8x64xf32>
    %109 = arith.maximumf %107, %108 : vector<8x64xf32>
    %c0_67 = arith.constant 0 : index
    %c0_68 = arith.constant 0 : index
    %110 = vector.load %arg6[%c0_67, %c0_68] : memref<64x1xf32, #tpu.memory_space<vmem>>, vector<64x1xf32>
    %cst_69 = arith.constant dense<0.000000e+00> : vector<8x1xf32>
    %111 = tpu.matmul %109, %110, %cst_69 {dimension_numbers = #tpu.dot_dimension_numbers<[1], [0], [0], [1], [0, 0, 1, 1], [], []>} : vector<8x64xf32>, vector<64x1xf32>, vector<8x1xf32> -> vector<8x1xf32>
    %c0_70 = arith.constant 0 : index
    %c0_71 = arith.constant 0 : index
    %112 = vector.load %arg7[%c0_70, %c0_71] : memref<1x1xf32, #tpu.memory_space<vmem>>, vector<1x1xf32>
    %113 = vector.broadcast %112 : vector<1x1xf32> to vector<8x1xf32>
    %114 = arith.addf %111, %113 : vector<8x1xf32>
    %115 = math.tanh %114 : vector<8x1xf32>
    %c0_72 = arith.constant 0 : index
    %c0_73 = arith.constant 0 : index
    %116 = vector.load %arg8[%c0_72, %c0_73] : memref<8x1xf32, #tpu.memory_space<vmem>>, vector<8x1xf32>
    tpu.vector_store %arg8[%c0_72, %c0_73], %115 {strides = array<i32>} : memref<8x1xf32, #tpu.memory_space<vmem>>, vector<8x1xf32>,
    return
  }
  func.func @transform_0(%arg0: i32) -> (i32, i32, i32) {
    %c0_i32 = arith.constant 0 : i32
    %c0_i32_0 = arith.constant 0 : i32
    %c0_i32_1 = arith.constant 0 : i32
    return %c0_i32, %arg0, %c0_i32_0 : i32, i32, i32
  }
  func.func @transform_1(%arg0: i32) -> (i32, i32) {
    %c0_i32 = arith.constant 0 : i32
    %c0_i32_0 = arith.constant 0 : i32
    %c0_i32_1 = arith.constant 0 : i32
    return %c0_i32, %c0_i32_0 : i32, i32
  }
  func.func @transform_2(%arg0: i32) -> i32 {
    %c0_i32 = arith.constant 0 : i32
    %c0_i32_0 = arith.constant 0 : i32
    return %c0_i32 : i32
  }
  func.func @transform_3(%arg0: i32) -> (i32, i32, i32) {
    %c0_i32 = arith.constant 0 : i32
    %c0_i32_0 = arith.constant 0 : i32
    %c0_i32_1 = arith.constant 0 : i32
    %c0_i32_2 = arith.constant 0 : i32
    return %c0_i32, %c0_i32_0, %c0_i32_1 : i32, i32, i32
  }
  func.func @transform_4(%arg0: i32) -> (i32, i32) {
    %c0_i32 = arith.constant 0 : i32
    %c0_i32_0 = arith.constant 0 : i32
    %c0_i32_1 = arith.constant 0 : i32
    return %c0_i32, %c0_i32_0 : i32, i32
  }
  func.func @transform_5(%arg0: i32) -> (i32, i32) {
    %c0_i32 = arith.constant 0 : i32
    %c0_i32_0 = arith.constant 0 : i32
    %c0_i32_1 = arith.constant 0 : i32
    return %c0_i32, %c0_i32_0 : i32, i32
  }
  func.func @transform_6(%arg0: i32) -> (i32, i32) {
    %c0_i32 = arith.constant 0 : i32
    %c0_i32_0 = arith.constant 0 : i32
    %c0_i32_1 = arith.constant 0 : i32
    return %c0_i32, %c0_i32_0 : i32, i32
  }
  func.func @transform_7(%arg0: i32) -> (i32, i32) {
    %c0_i32 = arith.constant 0 : i32
    %c0_i32_0 = arith.constant 0 : i32
    return %arg0, %c0_i32 : i32, i32
  }
}

</mosaic_0001>

<bundles_post_ra>
// kernel: tpu_custom_call.1
= control target key start
LH: loop header
LB: loop body
LE: loop exit
PB: predicated region body
PF: predicated region fallthrough
CT: control target
= control target key end

     0   :  { %s1107_s0 = inlined_call_operand.vmem [shape: f32[4,8,64], index: 0, kind: input, shape index: {}]   ;;  %s1108_s1 = inlined_call_operand.vmem [shape: f32[4,4], index: 1, kind: input, shape index: {}]   ;;  %s1109_s2 = inlined_call_operand.vmem [shape: f32[4], index: 2, kind: input, shape index: {}]   ;;  %s1110_s3 = inlined_call_operand.hbm [shape: f32[4,64,64], index: 3, kind: input, shape index: {}]   ;;  %s1111_s4 = inlined_call_operand.vmem [shape: f32[1,64], index: 4, kind: input, shape index: {}]   ;;  %s1112_s5 = inlined_call_operand.vmem [shape: f32[64,1], index: 5, kind: input, shape index: {}]   ;;  %s1113_s6 = inlined_call_operand.<no memory space> [shape: f32[1,1], index: 6, kind: input, shape index: {}]   ;;  %s1114_s7 = inlined_call_operand.vmem [shape: f32[8,1], index: 7, kind: output, shape index: {}]  }
   0x1   :  { %v12_v0 = vstv %s1113_s6 }
   0x2   :  { %13 = vst [vmem:[#allocation2] sm:$0x1] %v12_v0 }
   0x3   :  { %14 = vsyncpa [#allocation5], 0 }
   0x4   :  { %15 = vsyncpa [#allocation7], 0  ;;  %s25_s28 = sshll.u32 %s1108_s1, 4  ;;  %s26_s28 = int_to_ptr.vmem [resolvable:$true] %s25_s28 }
   0x5   :  { %16 = vsyncpa [#allocation4], 0  ;;  %s35_s8 = sshll.u32 %s1109_s2, 4  ;;  %s825_s9 = scalar_lea.vmem %s26_s28, 64  ;;  %s36_s8 = int_to_ptr.vmem [resolvable:$true] %s35_s8 }
   0x6   :  { %p826_p0 = scmp.ne.s32.totalorder %s26_s28, %s825_s9  ;;  %p830_p1 = scmp.lt.s32.totalorder %s26_s28, %s26_s28 }
   0x7   :  { %p831_p2 = scmp.lt.s32.totalorder %s825_s9, %s825_s9 }
   0x9   :  { %p832_p3 = por %p831_p2, %p830_p1 }
   0xb   :  { %p833_p4 = pnand %p832_p3, %p826_p0 }
   0xd   :  { %836 = shalt.err (!%p833_p4)
}
   0xe   :  { %s877_s6 = smov [#allocation3]   ;;  %s837_s10 = scalar_lea.vmem %s36_s8, 16 }
   0xf   :  { %28 = dma.vmem_to_smem %s26_s28, 64, %s877_s6, [#allocation5]  }
  0x10   :  { %p838_p5 = scmp.ne.s32.totalorder %s36_s8, %s837_s10  ;;  %p842_p6 = scmp.lt.s32.totalorder %s36_s8, %s36_s8 }
  0x11   :  { %p843_p7 = scmp.lt.s32.totalorder %s837_s10, %s837_s10 }
  0x13   :  { %p844_p8 = por %p843_p7, %p842_p6 }
  0x15   :  { %p845_p9 = pnand %p844_p8, %p838_p5 }
  0x17   :  { %848 = shalt.err (!%p845_p9)
}
  0x18   :  { %s878_s1 = smov [#allocation6]   ;;  %s879_s2 = smov [#allocation8]  }
  0x19   :  { %38 = dma.vmem_to_smem %s36_s8, 16, %s878_s1, [#allocation7]  }
  0x1a   :  { %s44_s11 = sshll.u32 %s879_s2, 4  ;;  %s849_s14 = scalar_lea.hbm %s1110_s3, 4096  ;;  %s45_s11 = int_to_ptr.vmem [resolvable:$true] %s44_s11 }
  0x1b   :  { %p850_p10 = scmp.ne.s32.totalorder %s1110_s3, %s849_s14  ;;  %p853_p11 = scmp.lt.u32.totalorder %s849_s14, %s1110_s3 }
  0x1d   :  { %p855_p12 = pnand %p853_p11, %p850_p10 }
  0x1f   :  { %858 = shalt.err (!%p855_p12)
}
  0x20   :  { %s859_s19 = scalar_lea.vmem %s45_s11, 4096  ;;  %p864_p0 = scmp.lt.s32.totalorder %s45_s11, %s45_s11 }
  0x21   :  { %p860_p13 = scmp.ne.s32.totalorder %s45_s11, %s859_s19  ;;  %p865_p1 = scmp.lt.s32.totalorder %s859_s19, %s859_s19 }
  0x23   :  { %p866_p2 = por %p865_p1, %p864_p0 }
  0x25   :  { %p867_p3 = pnand %p866_p2, %p860_p13 }
  0x27   :  { %870 = shalt.err (!%p867_p3)
}
  0x28   :  { %s880_s20 = smov 128   ;;  %s881_s21 = smov 8  }
  0x29   :  { %50 = dma.hbm_to_vmem [thread:$0]  %s1110_s3, 4096, %s45_s11, [#allocation4], %s880_s20, %s880_s20, %s881_s21  }
  0x2a   :  { %871 = dma.done.wait [#allocation5], 64  }
  0x2b   :  { %872 = vsyncadd [#allocation5], 4294967232 }
  0x2c   :  { %873 = dma.done.wait [#allocation7], 16  }
  0x2d   :  { %874 = vsyncadd [#allocation7], 4294967280 }
  0x2e   :  { %875 = dma.done.wait [#allocation4], 4096  }
  0x2f   :  { %876 = vsyncadd [#allocation4], 4294963200 }
  0x30   :  { %66 = sfence }
  0x31   :  { %v121_v1 = vld [vmem:[#allocation8 + $0x40] sm:$0xff]  ;;  %v122_v2 = vld [vmem:[#allocation8 + $0x48] sm:$0xff]  ;;  %v882_v4 = vmov 0.0|0.0   ;;  %v123_v7 = vld [vmem:[#allocation8 + $0x50] sm:$0xff]  ;;  %s948_s3 = sld [smem:[#allocation3 + $0x80]]  ;;  %vm883_vm0 = vmmov 0  }
  0x32   :  { %v93_v3 = vld [vmem:[#allocation8] sm:$0xff]  ;;  %755 = vmatprep.subr.bf16.mxu0 %v882_v4  ;;  %v756_v5 = vpack.c.bf16 %v122_v2, %v121_v1  ;;  %767 = vmatprep.subr.bf16.mxu1 %v882_v4  ;;  %v94_v6 = vld [vmem:[#allocation8 + $0x8] sm:$0xff]  ;;  %v124_v8 = vld [vmem:[#allocation8 + $0x58] sm:$0xff]  ;;  %v884_v12 = vmov 0.0   ;;  %s954_s24 = sld [smem:[#allocation3 + $0x81]]  ;;  %s956_s25 = sld [smem:[#allocation3 + $0x82]] }
  0x33   :  { %v768_v9 = vpack.c.bf16 %v94_v6, %v93_v3  ;;  %v95_v10 = vld [vmem:[#allocation8 + $0x10] sm:$0xff]  ;;  %v96_v11 = vld [vmem:[#allocation8 + $0x18] sm:$0xff]  ;;  %676 = vmatprep.mubr.msk.f32.mxu0 %vm883_vm0, %v884_v12  ;;  %695 = vmatprep.mubr.msk.f32.mxu1 %vm883_vm0, %v884_v12  ;;  %v759_v13 = vpack.c.bf16 %v124_v8, %v123_v7  ;;  %v125_v15 = vld [vmem:[#allocation8 + $0x60] sm:$0xff]  ;;  %s959_s26 = sld [smem:[#allocation3 + $0x83]]  ;;  %s967_s29 = sld [smem:[#allocation6 + $0x1]]  ;;  %vm129_vm1 = vcmask 523264  }
  0x34   :  { %757 = vmatpush3.bf16.msra.mxu0 %v756_v5  ;;  %v771_v14 = vpack.c.bf16 %v96_v11, %v95_v10  ;;  %v126_v16 = vld [vmem:[#allocation8 + $0x68] sm:$0xff]  ;;  %v97_v17 = vld [vmem:[#allocation8 + $0x20] sm:$0xff]  ;;  %s974_s9 = sld [smem:[#allocation3]]  ;;  %s976_s6 = sld [smem:[#allocation3 + $0x1]]  ;;  %v127_v25 = vld [vmem:[#allocation8 + $0x70] sm:$0xff]  ;;  %vm578_vm2 = vcmask 7168  }
  0x35   :  { %769 = vmatpush3.bf16.msra.mxu1 %v768_v9  ;;  %758 = vmatprep.subr.bf16.mxu0 %v882_v4  ;;  %v98_v18 = vld [vmem:[#allocation8 + $0x28] sm:$0xff]  ;;  %v965_v19 = vld [vmem:[%s1107_s0] sm:$0xff]  ;;  %v762_v21 = vpack.c.bf16 %v126_v16, %v125_v15  ;;  %s984_s2 = sld [smem:[#allocation3 + $0x2]]  ;;  %s986_s11 = sld [smem:[#allocation3 + $0x3]]  ;;  %v992_v27 = vld [vmem:[%s1107_s0 + $0x18] sm:$0xff] }
  0x36   :  { %770 = vmatprep.subr.bf16.mxu1 %v882_v4  ;;  %v972_v20 = vld [vmem:[%s1107_s0 + $0x8] sm:$0xff]  ;;  %v981_v22 = vld [vmem:[%s1107_s0 + $0x10] sm:$0xff]  ;;  %v774_v24 = vpack.c.bf16 %v98_v18, %v97_v17  ;;  %v128_v26 = vld [vmem:[#allocation8 + $0x78] sm:$0xff]  ;;  %s999_s14 = sld [smem:[#allocation3 + $0x100]]  ;;  %s1005_s0 = sld [smem:[#allocation3 + $0x101]] }
  0x37   :  { %v102_v23 = vstv %s948_s3  ;;  %v99_v30 = vld [vmem:[#allocation8 + $0x30] sm:$0xff]  ;;  %v100_v31 = vld [vmem:[#allocation8 + $0x38] sm:$0xff]  ;;  %s1003_s15 = sld [smem:[#allocation6]]  ;;  %v765_v36 = vpack.c.bf16 %v128_v26, %v127_v25  ;;  %s1008_s16 = sld [smem:[#allocation3 + $0x102]]  ;;  %v296_v52 = vld [vmem:[#allocation8 + $0x80] sm:$0xff] }
  0x38   :  { %760 = vmatpush3.bf16.msra.mxu0 %v759_v13  ;;  %v103_v28 = vmul.f32 %v102_v23, %v965_v19  ;;  %v105_v29 = vstv %s954_s24  ;;  %v109_v33 = vstv %s956_s25  ;;  %v777_v39 = vpack.c.bf16 %v100_v31, %v99_v30  ;;  %s1013_s17 = sld [smem:[#allocation3 + $0x103]]  ;;  %s1019_s18 = sld [smem:[#allocation3 + $0x180]]  ;;  %v297_v53 = vld [vmem:[#allocation8 + $0x88] sm:$0xff]  ;;  %v398_v63 = vld [vmem:[#allocation8 + $0xc0] sm:$0xff]  ;;  %v298_v6 = vld [vmem:[#allocation8 + $0x90] sm:$0xff] }
  0x39   :  { %772 = vmatpush3.bf16.msra.mxu1 %v771_v14  ;;  %761 = vmatprep.subr.bf16.mxu0 %v882_v4  ;;  %v106_v32 = vmul.f32 %v972_v20, %v105_v29  ;;  %v110_v34 = vmul.f32 %v981_v22, %v109_v33  ;;  %v113_v35 = vstv %s959_s26  ;;  %s1021_s19 = sld [smem:[#allocation3 + $0x181]]  ;;  %v117_v46 = vstv %s967_s29  ;;  %s1026_s20 = sld [smem:[#allocation3 + $0x182]]  ;;  %v399_v5 = vld [vmem:[#allocation8 + $0xc8] sm:$0xff]  ;;  %v299_v7 = vld [vmem:[#allocation8 + $0x98] sm:$0xff]  ;;  %v400_v23 = vld [vmem:[#allocation8 + $0xd0] sm:$0xff] }
  0x3a   :  { %773 = vmatprep.subr.bf16.mxu1 %v882_v4  ;;  %v114_v38 = vmul.f32 %v992_v27, %v113_v35  ;;  %v75_v40 = vstv %s974_s9  ;;  %v78_v41 = vstv %s976_s6  ;;  %s1028_s21 = sld [smem:[#allocation3 + $0x183]]  ;;  %v780_v62 = vpack.c.bf16 %v297_v53, %v296_v52  ;;  %s1041_s22 = sld [smem:[#allocation6 + $0x2]]  ;;  %v301_v29 = vld [vmem:[#allocation8 + $0xa8] sm:$0xff]  ;;  %v492_v53 = vld [vmem:[%s1112_s5 + $0x18] sm:$0xff] }
  0x3b   :  { %v107_v37 = vadd.f32 %v106_v32, %v103_v28  ;;  %v76_v43 = vmul.f32 %v75_v40, %v965_v19  ;;  %v79_v44 = vmul.f32 %v972_v20, %v78_v41  ;;  %v82_v45 = vstv %s984_s2  ;;  %s1054_s23 = sld [smem:[#allocation6 + $0x3]]  ;;  %v401_v28 = vld [vmem:[#allocation8 + $0xd8] sm:$0xff] }
  0x3c   :  { %763 = vmatpush3.bf16.msra.mxu0 %v762_v21  ;;  %v83_v47 = vmul.f32 %v981_v22, %v82_v45  ;;  %v86_v48 = vstv %s986_s11  ;;  %v277_v54 = vstv %s999_s14  ;;  %v280_v56 = vstv %s1005_s0 }
  0x3d   :  { %775 = vmatpush3.bf16.msra.mxu1 %v774_v24  ;;  %764 = vmatprep.subr.bf16.mxu0 %v882_v4  ;;  %v111_v42 = vadd.f32 %v110_v34, %v107_v37  ;;  %v80_v50 = vadd.f32 %v79_v44, %v76_v43  ;;  %v87_v51 = vmul.f32 %v992_v27, %v86_v48  ;;  %v284_v60 = vstv %s1008_s16  ;;  %v402_v34 = vld [vmem:[#allocation8 + $0xe0] sm:$0xff]  ;;  %v302_v37 = vld [vmem:[#allocation8 + $0xb0] sm:$0xff]  ;;  %v405_v44 = vld [vmem:[#allocation8 + $0xf8] sm:$0xff] }
  0x3e   :  { %776 = vmatprep.subr.bf16.mxu1 %v882_v4  ;;  %v278_v55 = vmul.f32 %v277_v54, %v965_v19  ;;  %v281_v59 = vmul.f32 %v972_v20, %v280_v56  ;;  %v90_v61 = vstv %s1003_s15  ;;  %v285_v0 = vmul.f32 %v981_v22, %v284_v60  ;;  %v404_v43 = vld [vmem:[#allocation8 + $0xf0] sm:$0xff]  ;;  %v493_v54 = vld [vmem:[%s1112_s5 + $0x20] sm:$0xff] }
  0x3f   :  { %v115_v49 = vadd.f32 %v114_v38, %v111_v42  ;;  %v84_v58 = vadd.f32 %v83_v47, %v80_v50  ;;  %v288_v1 = vstv %s1013_s17  ;;  %v379_v10 = vstv %s1019_s18  ;;  %v303_v38 = vld [vmem:[#allocation8 + $0xb8] sm:$0xff]  ;;  %v490_v50 = vld [vmem:[%s1112_s5 + $0x8] sm:$0xff] }
  0x40   :  { %766 = vmatpush3.bf16.msra.mxu0 %v765_v36  ;;  %v282_v8 = vadd.f32 %v281_v59, %v278_v55  ;;  %v289_v9 = vmul.f32 %v992_v27, %v288_v1  ;;  %v382_v11 = vstv %s1021_s19  ;;  %v386_v13 = vstv %s1026_s20  ;;  %v403_v36 = vld [vmem:[#allocation8 + $0xe8] sm:$0xff] }
  0x41   :  { %778 = vmatpush3.bf16.msra.mxu1 %v777_v39  ;;  %779 = vmatprep.subr.bf16.mxu0 %v882_v4  ;;  %v118_v57 = vadd.f32 %v117_v46, %v115_v49  ;;  %v88_v3 = vadd.f32 %v87_v51, %v84_v58  ;;  %v380_v16 = vmul.f32 %v379_v10, %v965_v19  ;;  %v390_v25 = vstv %s1028_s21  ;;  %v300_v19 = vld [vmem:[#allocation8 + $0xa0] sm:$0xff]  ;;  %v491_v51 = vld [vmem:[%s1112_s5 + $0x10] sm:$0xff]  ;;  %v496_v58 = vld [vmem:[%s1112_s5 + $0x38] sm:$0xff] }
  0x42   :  { %791 = vmatprep.subr.bf16.mxu1 %v882_v4  ;;  %v286_v15 = vadd.f32 %v285_v0, %v282_v8  ;;  %v383_v17 = vmul.f32 %v972_v20, %v382_v11  ;;  %v792_v18 = vpack.c.bf16 %v399_v5, %v398_v63  ;;  %v783_v21 = vpack.c.bf16 %v299_v7, %v298_v6  ;;  %v489_v49 = vld [vmem:[%s1112_s5] sm:$0xff]  ;;  %v494_v55 = vld [vmem:[%s1112_s5 + $0x28] sm:$0xff] }
  0x43   :  { %v119_v2 = vmax.f32 %v118_v57, 0.0  ;;  %v91_v14 = vadd.f32 %v90_v61, %v88_v3  ;;  %v387_v24 = vmul.f32 %v981_v22, %v386_v13  ;;  %v391_v32 = vmul.f32 %v992_v27, %v390_v25  ;;  %v495_v57 = vld [vmem:[%s1112_s5 + $0x30] sm:$0xff]  ;;  %v613_v10 = vld [vmem:[#allocation2] ss:$0 sm:$0xff] }
  0x44   :  { %v384_v20 = vadd.f32 %v383_v17, %v380_v16  ;;  %v290_v30 = vadd.f32 %v289_v9, %v286_v15  ;;  %v795_v22 = vpack.c.bf16 %v401_v28, %v400_v23  ;;  %v786_v33 = vpack.c.bf16 %v301_v29, %v300_v19 }
  0x45   :  { %677 = vmatmul.mubr.msk.f32.vlgmr.msra.gmra.mrb[0].mxu0 %vm129_vm1, %v119_v2  ;;  %v92_v26 = vmax.f32 %v91_v14, 0.0  ;;  %v292_v35 = vstv %s1041_s22  ;;  %v798_v27 = vpack.c.bf16 %v403_v36, %v402_v34  ;;  %v789_v41 = vpack.c.bf16 %v303_v38, %v302_v37 }
  0x46   :  { %781 = vmatpush3.bf16.msra.mxu0 %v780_v62  ;;  %714 = vmatprep.mubr.msk.f32.mxu0 %vm883_vm0, %v884_v12  ;;  %v388_v31 = vadd.f32 %v387_v24, %v384_v20  ;;  %v293_v39 = vadd.f32 %v292_v35, %v290_v30  ;;  %v394_v42 = vstv %s1054_s23  ;;  %v801_v47 = vpack.c.bf16 %v405_v44, %v404_v43 }
  0x47   :  { %782 = vmatprep.subr.bf16.mxu0 %v882_v4  ;;  %696 = vmatmul.mubr.msk.f32.vlgmr.msra.gmra.mrb[0].mxu1 %vm129_vm1, %v92_v26  ;;  %v804_v52 = vpack.c.bf16 %v490_v50, %v489_v49  ;;  %v810_v56 = vpack.c.bf16 %v494_v55, %v493_v54  ;;  %v813_v59 = vpack.c.bf16 %v496_v58, %v495_v57 }
  0x48   :  { %793 = vmatpush3.bf16.msra.mxu1 %v792_v18  ;;  %733 = vmatprep.mubr.msk.f32.mxu1 %vm883_vm0, %v884_v12  ;;  %v392_v40 = vadd.f32 %v391_v32, %v388_v31  ;;  %v294_v45 = vmax.f32 %v293_v39, 0.0 }
  0x49   :  { %794 = vmatprep.subr.bf16.mxu1 %v882_v4 }
  0x4a   :  { %784 = vmatpush3.bf16.msra.mxu0 %v783_v21  ;;  %v395_v46 = vadd.f32 %v394_v42, %v392_v40 }
  0x4b   :  { %785 = vmatprep.subr.bf16.mxu0 %v882_v4 }
  0x4c   :  { %796 = vmatpush3.bf16.msra.mxu1 %v795_v22  ;;  %v396_v48 = vmax.f32 %v395_v46, 0.0 }
  0x4d   :  { %797 = vmatprep.subr.bf16.mxu1 %v882_v4 }
  0x4e   :  { %787 = vmatpush3.bf16.msra.mxu0 %v786_v33 }
  0x4f   :  { %788 = vmatprep.subr.bf16.mxu0 %v882_v4 }
  0x50   :  { %799 = vmatpush3.bf16.msra.mxu1 %v798_v27 }
  0x51   :  { %800 = vmatprep.subr.bf16.mxu1 %v882_v4 }
  0x52   :  { %790 = vmatpush3.bf16.msra.mxu0 %v789_v41 }
  0x53   :  { %803 = vmatprep.subr.bf16.mxu0 %v882_v4 }
  0x54   :  { %802 = vmatpush3.bf16.msra.mxu1 %v801_v47 }
  0x55   :  { %715 = vmatmul.mubr.msk.f32.vlgmr.msra.gmra.mrb[2].mxu0 %vm129_vm1, %v294_v45 }
  0x56   :  { %752 = vmatprep.mubr.msk.f32.mxu0 %vm883_vm0, %v884_v12  ;;  %805 = vmatpush3.bf16.msra.mxu0 %v804_v52  ;;  %v807_v12 = vpack.c.bf16 %v492_v53, %v491_v51 }
  0x57   :  { %734 = vmatmul.mubr.msk.f32.vlgmr.msra.gmra.mrb[2].mxu1 %vm129_vm1, %v396_v48  ;;  %806 = vmatprep.subr.bf16.mxu0 %v882_v4 }
  0x5a   :  { %808 = vmatpush3.bf16.msra.mxu0 %v807_v12 }
  0x5b   :  { %809 = vmatprep.subr.bf16.mxu0 %v882_v4 }
  0x5e   :  { %811 = vmatpush3.bf16.msra.mxu0 %v810_v56 }
  0x5f   :  { %812 = vmatprep.subr.bf16.mxu0 %v882_v4  ;;  %v612_v4 = vld [vmem:[%s1111_s4] ss:$0 sm:$0xff] }
  0x62   :  { %814 = vmatpush3.bf16.msra.mxu0 %v813_v59 }
 0x118   :  { %v199_v60 = vpop.f32.mrb[0].mxu0 }
 0x119   :  { %v678_v61 = vpop.f32.mrb[1].mxu0 }
 0x11a   :  { %v272_v62 = vpop.f32.mrb[0].mxu1 }
 0x11b   :  { %v273_v63 = vadd.f32 %v272_v62, %v199_v60  ;;  %v697_v0 = vpop.f32.mrb[1].mxu1 }
 0x128   :  { %v373_v1 = vpop.f32.mrb[2].mxu0 }
 0x129   :  { %v377_v2 = vadd.f32 %v373_v1, %v273_v63  ;;  %v716_v3 = vpop.f32.mrb[3].mxu0 }
 0x12a   :  { %v475_v5 = vpop.f32.mrb[2].mxu1 }
 0x12b   :  { %v479_v6 = vadd.f32 %v475_v5, %v377_v2  ;;  %v735_v7 = vpop.f32.mrb[3].mxu1 }
 0x12d   :  { %v487_v8 = vadd.f32 %v612_v4, %v479_v6 }
 0x12f   :  { %v488_v9 = vmax.f32 %v487_v8, 0.0 }
 0x131   :  { %753 = vmatmul.mubr.msk.f32.vlgmr.msra.gmra.mrb[4].mxu0 %vm129_vm1, %v488_v9 }
 0x204   :  { %v573_v11 = vpop.f32.mrb[4].mxu0 }
 0x205   :  { %v574_v13 = vadd.f32 %v613_v10, %v573_v11  ;;  %v754_v14 = vpop.f32.mrb[5].mxu0 }
 0x207   :  { %823 = vtanh.f32 %v574_v13 }
 0x211   :  { %v824_v15 = vpop.eup %823 }
 0x212   :  { %579 = vst.msk [vmem:[%s1114_s7] sm:$0xff] %vm578_vm2, %v824_v15 }
 0x213   :  { %584 = vsyncpa [#allocation4], 1 }
 0x214   :  { %585 = vsyncpa [#allocation5], 1 }
 0x215   :  { %586 = vsyncpa [#allocation7], 1 }

</bundles_post_ra>
